<compile_context>
chip_gen: v5e
topology: v5e:2x2
jax: 0.10.0
libtpu: 0.0.40
codegen_flags: <defaults>
</compile_context>

<pallas_src>
import functools

import jax
import jax.numpy as jnp
from jax.experimental import pallas as pl
from jax.experimental.pallas import tpu as pltpu

IN_FEATURES = 784
HIDDEN = 75
HIDDEN_PAD = 128          # lane-dense hidden (zero padding is exact)
OUT_FEATURES = 10


def mlp_kernel(x_ref, w1_ref, b1_ref, w2_ref, b2_ref, o_ref):
    # ----- fc1: bf16 MXU matmul, f32 accumulate; bias + ReLU in f32 on VPU -----
    h = jnp.dot(x_ref[...], w1_ref[...], preferred_element_type=jnp.float32)
    h = jnp.maximum(h + b1_ref[...], 0.0)                      # (TB, 128) f32

    # TODO(synk): nn.Dropout(p=0.2) is identity at inference; training-mode
    # stochastic masking (pltpu.prng_random_bits) intentionally omitted.

    # ----- fc2: padded hidden rows of w2 are zero, so the extra K is exact -----
    logits = jnp.dot(h.astype(jnp.bfloat16), w2_ref[...],
                     preferred_element_type=jnp.float32)
    logits = logits + b2_ref[...]                              # (TB, 10) f32

    # ----- log_softmax along dim=1 (numerically stable, f32 epilogue) -----
    m = jnp.max(logits, axis=-1, keepdims=True)
    s = logits - m
    lse = jnp.log(jnp.sum(jnp.exp(s), axis=-1, keepdims=True))
    o_ref[...] = s - lse


def _round_up(n, m):
    return (n + m - 1) // m * m


def prepare_params(w1, b1, w2, b2):
    """Zero-pad hidden 75->128 and cast matmul operands to bf16 (biases stay f32)."""
    w1p = jnp.zeros((IN_FEATURES, HIDDEN_PAD), jnp.bfloat16)
    w1p = w1p.at[:, :HIDDEN].set(w1.astype(jnp.bfloat16))
    b1p = jnp.zeros((1, HIDDEN_PAD), jnp.float32)
    b1p = b1p.at[:, :HIDDEN].set(b1.astype(jnp.float32).reshape(1, HIDDEN))
    w2p = jnp.zeros((HIDDEN_PAD, OUT_FEATURES), jnp.bfloat16)
    w2p = w2p.at[:HIDDEN, :].set(w2.astype(jnp.bfloat16))
    b2p = b2.astype(jnp.float32).reshape(1, OUT_FEATURES)
    return w1p, b1p, w2p, b2p


@functools.partial(jax.jit, static_argnames=("block_b",))
def network_forward(x, w1p, b1p, w2p, b2p, *, block_b=1024):
    """x: (B, ...) -> log-probs (B, 10) f32."""
    B = x.shape[0]
    # Mimic x.view(B, -1); cast upstream so the HBM copy the kernel reads is bf16.
    x = x.reshape(B, -1).astype(jnp.bfloat16)

    # Batch tile: multiple of 8 sublanes, no bigger than needed for small B.
    tb = _round_up(min(block_b, _round_up(B, 8)), 8)
    Bp = _round_up(B, tb)
    if Bp != B:
        x = jnp.pad(x, ((0, Bp - B), (0, 0)))   # padded rows are sliced off below

    out = pl.pallas_call(
        mlp_kernel,
        out_shape=jax.ShapeDtypeStruct((Bp, OUT_FEATURES), jnp.float32),
        grid_spec=pltpu.PrefetchScalarGridSpec(
            num_scalar_prefetch=0,
            grid=(Bp // tb,),
            in_specs=[
                pl.BlockSpec((tb, IN_FEATURES), lambda i: (i, 0)),      # x tile
                pl.BlockSpec((IN_FEATURES, HIDDEN_PAD), lambda i: (0, 0)),  # w1 (resident)
                pl.BlockSpec((1, HIDDEN_PAD), lambda i: (0, 0)),        # b1 (resident)
                pl.BlockSpec((HIDDEN_PAD, OUT_FEATURES), lambda i: (0, 0)),  # w2 (resident)
                pl.BlockSpec((1, OUT_FEATURES), lambda i: (0, 0)),      # b2 (resident)
            ],
            out_specs=pl.BlockSpec((tb, OUT_FEATURES), lambda i: (i, 0)),
        ),
        compiler_params=pltpu.CompilerParams(
            dimension_semantics=("parallel",),   # shard batch tiles across TCs (v7x)
        ),
    )(x, w1p, b1p, w2p, b2p)
    return out[:B]


def init_params(key):
    """PyTorch nn.Linear-style init (U(-1/sqrt(fan_in), +)); weights stored (in, out)."""
    k1, k2, k3, k4 = jax.random.split(key, 4)
    bound1 = 1.0 / jnp.sqrt(784.0)
    bound2 = 1.0 / jnp.sqrt(75.0)
    w1 = jax.random.uniform(k1, (IN_FEATURES, HIDDEN), jnp.float32, -bound1, bound1)
    b1 = jax.random.uniform(k2, (1, HIDDEN), jnp.float32, -bound1, bound1)
    w2 = jax.random.uniform(k3, (HIDDEN, OUT_FEATURES), jnp.float32, -bound2, bound2)
    b2 = jax.random.uniform(k4, (1, OUT_FEATURES), jnp.float32, -bound2, bound2)
    return w1, b1, w2, b2


def reference_forward_f32(x, w1, b1, w2, b2):
    xf = x.reshape(x.shape[0], -1)
    h = jnp.maximum(xf @ w1 + b1, 0.0)
    logits = h @ w2 + b2
    return jax.nn.log_softmax(logits, axis=1)


def reference_forward_bf16(x, w1p, b1p, w2p, b2p):
    """Same dtype pipeline as the kernel (bf16 matmul inputs, f32 accumulate)."""
    xf = x.reshape(x.shape[0], -1).astype(jnp.bfloat16)
    h = jnp.dot(xf, w1p, preferred_element_type=jnp.float32) + b1p
    h = jnp.maximum(h, 0.0)
    logits = jnp.dot(h.astype(jnp.bfloat16), w2p,
                     preferred_element_type=jnp.float32) + b2p
    return jax.nn.log_softmax(logits, axis=1)


if __name__ == "__main__":
    key = jax.random.PRNGKey(0)
    kx, kp = jax.random.split(key)

    B = 20  # small, non-multiple-of-8 batch to exercise tail padding
    x = jax.random.uniform(kx, (B, IN_FEATURES), jnp.float32)

    w1, b1, w2, b2 = init_params(kp)
    w1p, b1p, w2p, b2p = prepare_params(w1, b1, w2, b2)

    # Single-tile run.
    out = network_forward(x, w1p, b1p, w2p, b2p)
    out = jax.block_until_ready(out)

    # Multi-tile run (block_b=8 -> grid of 3 steps) must agree.
    out_tiled = network_forward(x, w1p, b1p, w2p, b2p, block_b=8)
    out_tiled = jax.block_until_ready(out_tiled)

    ref_bf16 = reference_forward_bf16(x, w1p, b1p, w2p, b2p)
    ref_f32 = reference_forward_f32(x, w1, b1, w2, b2)

    assert out.shape == (B, OUT_FEATURES)
    assert jnp.allclose(out, ref_bf16, atol=1e-4, rtol=1e-4), "mismatch vs bf16 reference"
    assert jnp.allclose(out_tiled, out, atol=1e-5, rtol=1e-5), "tiled run mismatch"
    assert jnp.allclose(out, ref_f32, atol=5e-2, rtol=5e-2), "mismatch vs f32 reference"
    # log_softmax rows should exp-sum to 1
    assert jnp.allclose(jnp.sum(jnp.exp(out), axis=1), 1.0, atol=1e-4)

    print("KERNEL_OK")
</pallas_src>

<mosaic_0001>
module attributes {stable_mosaic.version = 11 : i64} {
  func.func @mlp_kernel(%arg0: i32, %arg1: memref<24x784xbf16, #tpu.memory_space<vmem>>, %arg2: memref<784x128xbf16, #tpu.memory_space<vmem>>, %arg3: memref<1x128xf32, #tpu.memory_space<vmem>>, %arg4: memref<128x10xbf16, #tpu.memory_space<vmem>>, %arg5: memref<1x10xf32, #tpu.memory_space<vmem>>, %arg6: memref<24x10xf32, #tpu.memory_space<vmem>>) attributes {dimension_semantics = [#tpu.dimension_semantics<parallel>], iteration_bounds = array<i64: 1>, scalar_prefetch = 0 : i64, scratch_operands = 0 : i64, tpu.core_type = #tpu.core_type<tc>, window_params = [{transform_indices = @transform_0, window_bounds = array<i64: 24, 784>}, {pipeline_mode = #tpu.pipeline_mode<synchronous>, transform_indices = @transform_1, window_bounds = array<i64: 784, 128>}, {pipeline_mode = #tpu.pipeline_mode<synchronous>, transform_indices = @transform_2, window_bounds = array<i64: 1, 128>}, {pipeline_mode = #tpu.pipeline_mode<synchronous>, transform_indices = @transform_3, window_bounds = array<i64: 128, 10>}, {pipeline_mode = #tpu.pipeline_mode<synchronous>, transform_indices = @transform_4, window_bounds = array<i64: 1, 10>}, {transform_indices = @transform_5, window_bounds = array<i64: 24, 10>}]} {
    %c0 = arith.constant 0 : index
    %c0_0 = arith.constant 0 : index
    %0 = vector.load %arg1[%c0, %c0_0] : memref<24x784xbf16, #tpu.memory_space<vmem>>, vector<24x784xbf16>
    %c0_1 = arith.constant 0 : index
    %c0_2 = arith.constant 0 : index
    %1 = vector.load %arg2[%c0_1, %c0_2] : memref<784x128xbf16, #tpu.memory_space<vmem>>, vector<784x128xbf16>
    %cst = arith.constant dense<0.000000e+00> : vector<24x128xf32>
    %2 = tpu.matmul %0, %1, %cst {dimension_numbers = #tpu.dot_dimension_numbers<[1], [0], [0], [1], [0, 0, 1, 1], [], []>} : vector<24x784xbf16>, vector<784x128xbf16>, vector<24x128xf32> -> vector<24x128xf32>
    %c0_3 = arith.constant 0 : index
    %c0_4 = arith.constant 0 : index
    %3 = vector.load %arg3[%c0_3, %c0_4] : memref<1x128xf32, #tpu.memory_space<vmem>>, vector<1x128xf32>
    %4 = vector.broadcast %3 : vector<1x128xf32> to vector<24x128xf32>
    %5 = arith.addf %2, %4 : vector<24x128xf32>
    %cst_5 = arith.constant 0.000000e+00 : f32
    %6 = vector.broadcast %cst_5 : f32 to vector<24x128xf32>
    %7 = arith.maximumf %5, %6 : vector<24x128xf32>
    %8 = arith.truncf %7 : vector<24x128xf32> to vector<24x128xbf16>
    %c0_6 = arith.constant 0 : index
    %c0_7 = arith.constant 0 : index
    %9 = vector.load %arg4[%c0_6, %c0_7] : memref<128x10xbf16, #tpu.memory_space<vmem>>, vector<128x10xbf16>
    %cst_8 = arith.constant dense<0.000000e+00> : vector<24x10xf32>
    %10 = tpu.matmul %8, %9, %cst_8 {dimension_numbers = #tpu.dot_dimension_numbers<[1], [0], [0], [1], [0, 0, 1, 1], [], []>} : vector<24x128xbf16>, vector<128x10xbf16>, vector<24x10xf32> -> vector<24x10xf32>
    %c0_9 = arith.constant 0 : index
    %c0_10 = arith.constant 0 : index
    %11 = vector.load %arg5[%c0_9, %c0_10] : memref<1x10xf32, #tpu.memory_space<vmem>>, vector<1x10xf32>
    %12 = vector.broadcast %11 : vector<1x10xf32> to vector<24x10xf32>
    %13 = arith.addf %10, %12 : vector<24x10xf32>
    %cst_11 = arith.constant dense<0xFF800000> : vector<24xf32>
    %14 = vector.multi_reduction <maximumf>, %13, %cst_11 [1] : vector<24x10xf32> to vector<24xf32>
    %15 = vector.shape_cast %14 : vector<24xf32> to vector<24x1xf32>
    %16 = vector.broadcast %15 : vector<24x1xf32> to vector<24x10xf32>
    %17 = arith.subf %13, %16 : vector<24x10xf32>
    %18 = math.exp %17 : vector<24x10xf32>
    %cst_12 = arith.constant dense<0.000000e+00> : vector<24xf32>
    %19 = vector.multi_reduction <add>, %18, %cst_12 [1] : vector<24x10xf32> to vector<24xf32>
    %20 = vector.shape_cast %19 : vector<24xf32> to vector<24x1xf32>
    %21 = math.log %20 : vector<24x1xf32>
    %22 = vector.broadcast %21 : vector<24x1xf32> to vector<24x10xf32>
    %23 = arith.subf %17, %22 : vector<24x10xf32>
    %c0_13 = arith.constant 0 : index
    %c0_14 = arith.constant 0 : index
    %24 = vector.load %arg6[%c0_13, %c0_14] : memref<24x10xf32, #tpu.memory_space<vmem>>, vector<24x10xf32>
    tpu.vector_store %arg6[%c0_13, %c0_14], %23 {strides = array<i32>} : memref<24x10xf32, #tpu.memory_space<vmem>>, vector<24x10xf32>,
    return
  }
  func.func @transform_0(%arg0: i32) -> (i32, i32) {
    %c0_i32 = arith.constant 0 : i32
    %c0_i32_0 = arith.constant 0 : i32
    return %arg0, %c0_i32 : i32, i32
  }
  func.func @transform_1(%arg0: i32) -> (i32, i32) {
    %c0_i32 = arith.constant 0 : i32
    %c0_i32_0 = arith.constant 0 : i32
    %c0_i32_1 = arith.constant 0 : i32
    return %c0_i32, %c0_i32_0 : i32, i32
  }
  func.func @transform_2(%arg0: i32) -> (i32, i32) {
    %c0_i32 = arith.constant 0 : i32
    %c0_i32_0 = arith.constant 0 : i32
    %c0_i32_1 = arith.constant 0 : i32
    return %c0_i32, %c0_i32_0 : i32, i32
  }
  func.func @transform_3(%arg0: i32) -> (i32, i32) {
    %c0_i32 = arith.constant 0 : i32
    %c0_i32_0 = arith.constant 0 : i32
    %c0_i32_1 = arith.constant 0 : i32
    return %c0_i32, %c0_i32_0 : i32, i32
  }
  func.func @transform_4(%arg0: i32) -> (i32, i32) {
    %c0_i32 = arith.constant 0 : i32
    %c0_i32_0 = arith.constant 0 : i32
    %c0_i32_1 = arith.constant 0 : i32
    return %c0_i32, %c0_i32_0 : i32, i32
  }
  func.func @transform_5(%arg0: i32) -> (i32, i32) {
    %c0_i32 = arith.constant 0 : i32
    %c0_i32_0 = arith.constant 0 : i32
    return %arg0, %c0_i32 : i32, i32
  }
}

</mosaic_0001>

<bundles_post_ra>
// kernel: network_forward.1
= control target key start
LH: loop header
LB: loop body
LE: loop exit
PB: predicated region body
PF: predicated region fallthrough
CT: control target
= control target key end

     0   :  { %vm488_vm0 = vcmask 130048   ;;  %vm712_vm1 = vcmask 80896   ;;  %s1371_s1 = inlined_call_operand.vmem [shape: bf16[784,128], index: 1, kind: input, shape index: {}]   ;;  %s1372_s2 = inlined_call_operand.vmem [shape: f32[1,128], index: 2, kind: input, shape index: {}]   ;;  %s1373_s0 = inlined_call_operand.vmem [shape: bf16[24,784], index: 0, kind: input, shape index: {}]   ;;  %s1374_s4 = inlined_call_operand.vmem [shape: f32[1,10], index: 4, kind: input, shape index: {}]   ;;  %s1375_s3 = inlined_call_operand.vmem [shape: bf16[128,10], index: 3, kind: input, shape index: {}]   ;;  %s1376_s5 = inlined_call_operand.vmem [shape: f32[24,10], index: 5, kind: output, shape index: {}]  }
   0x1   :  { %v1028_v0 = vld [vmem:[%s1371_s1 + $0x38] sm:$0xff]  ;;  %v1027_v4 = vld [vmem:[%s1371_s1 + $0x30] sm:$0xff]  ;;  %v1026_v8 = vld [vmem:[%s1371_s1 + $0x28] sm:$0xff] }
   0x2   :  { %v1036_v1 = vld [vmem:[%s1371_s1 + $0x78] sm:$0xff]  ;;  %495 = vmatpush.bf16.msra.mxu0 %v1028_v0  ;;  %v1035_v5 = vld [vmem:[%s1371_s1 + $0x70] sm:$0xff]  ;;  %v1034_v9 = vld [vmem:[%s1371_s1 + $0x68] sm:$0xff] }
   0x3   :  { %v1044_v2 = vld [vmem:[%s1371_s1 + $0xb8] sm:$0xff]  ;;  %513 = vmatpush.bf16.msra.mxu1 %v1036_v1  ;;  %v1043_v6 = vld [vmem:[%s1371_s1 + $0xb0] sm:$0xff]  ;;  %v1042_v10 = vld [vmem:[%s1371_s1 + $0xa8] sm:$0xff] }
   0x4   :  { %v1052_v3 = vld [vmem:[%s1371_s1 + $0xf8] sm:$0xff]  ;;  %531 = vmatpush.bf16.msra.mxu2 %v1044_v2  ;;  %v1051_v7 = vld [vmem:[%s1371_s1 + $0xf0] sm:$0xff]  ;;  %v1050_v11 = vld [vmem:[%s1371_s1 + $0xe8] sm:$0xff] }
   0x5   :  { %549 = vmatpush.bf16.msra.mxu3 %v1052_v3  ;;  %v1025_v12 = vld [vmem:[%s1371_s1 + $0x20] sm:$0xff]  ;;  %v1024_v16 = vld [vmem:[%s1371_s1 + $0x18] sm:$0xff]  ;;  %v1023_v20 = vld [vmem:[%s1371_s1 + $0x10] sm:$0xff] }
   0x6   :  { %496 = vmatpush.bf16.msra.mxu0 %v1027_v4  ;;  %v1033_v13 = vld [vmem:[%s1371_s1 + $0x60] sm:$0xff]  ;;  %v1032_v17 = vld [vmem:[%s1371_s1 + $0x58] sm:$0xff]  ;;  %v1031_v21 = vld [vmem:[%s1371_s1 + $0x50] sm:$0xff] }
   0x7   :  { %514 = vmatpush.bf16.msra.mxu1 %v1035_v5  ;;  %v1041_v14 = vld [vmem:[%s1371_s1 + $0xa0] sm:$0xff]  ;;  %v1040_v18 = vld [vmem:[%s1371_s1 + $0x98] sm:$0xff]  ;;  %v1039_v22 = vld [vmem:[%s1371_s1 + $0x90] sm:$0xff] }
   0x8   :  { %532 = vmatpush.bf16.msra.mxu2 %v1043_v6  ;;  %v1049_v15 = vld [vmem:[%s1371_s1 + $0xe0] sm:$0xff]  ;;  %v1048_v19 = vld [vmem:[%s1371_s1 + $0xd8] sm:$0xff]  ;;  %v1047_v23 = vld [vmem:[%s1371_s1 + $0xd0] sm:$0xff] }
   0x9   :  { %550 = vmatpush.bf16.msra.mxu3 %v1051_v7  ;;  %v1022_v24 = vld [vmem:[%s1371_s1 + $0x8] sm:$0xff]  ;;  %v1021_v28 = vld [vmem:[%s1371_s1] sm:$0xff]  ;;  %v1017_v33 = vld [vmem:[%s1373_s0 + $0x18] sm:$0xf0] }
   0xa   :  { %497 = vmatpush.bf16.msra.mxu0 %v1026_v8  ;;  %v1030_v25 = vld [vmem:[%s1371_s1 + $0x48] sm:$0xff]  ;;  %v1029_v29 = vld [vmem:[%s1371_s1 + $0x40] sm:$0xff]  ;;  %v1060_v39 = vld [vmem:[%s1371_s1 + $0x138] sm:$0xff] }
   0xb   :  { %515 = vmatpush.bf16.msra.mxu1 %v1034_v9  ;;  %v1038_v26 = vld [vmem:[%s1371_s1 + $0x88] sm:$0xff]  ;;  %v1037_v30 = vld [vmem:[%s1371_s1 + $0x80] sm:$0xff]  ;;  %v1068_v45 = vld [vmem:[%s1371_s1 + $0x178] sm:$0xff] }
   0xc   :  { %533 = vmatpush.bf16.msra.mxu2 %v1042_v10  ;;  %v1046_v27 = vld [vmem:[%s1371_s1 + $0xc8] sm:$0xff]  ;;  %v1045_v31 = vld [vmem:[%s1371_s1 + $0xc0] sm:$0xff]  ;;  %v1059_v47 = vld [vmem:[%s1371_s1 + $0x130] sm:$0xff] }
   0xd   :  { %551 = vmatpush.bf16.msra.mxu3 %v1050_v11  ;;  %v758_v32 = vld [vmem:[%s1373_s0] sm:$0xf]  ;;  %v1014_v34 = vld [vmem:[%s1373_s0 + $0x4] sm:$0xf]  ;;  %v766_v36 = vld [vmem:[%s1373_s0 + $0x8] sm:$0xf] }
   0xe   :  { %498 = vmatpush.bf16.msra.mxu0 %v1025_v12  ;;  %v760_v35 = vld [vmem:[%s1373_s0 + $0x1c] sm:$0xf0]  ;;  %v1018_v37 = vld [vmem:[%s1373_s0 + $0x20] sm:$0xf0]  ;;  %v1015_v40 = vld [vmem:[%s1373_s0 + $0xc] sm:$0xf]  ;;  %v759_v42 = vor.u32 %v1017_v33, %v758_v32 }
   0xf   :  { %516 = vmatpush.bf16.msra.mxu1 %v1033_v13  ;;  %v1069_v38 = vld [vmem:[%s1371_s1 + $0x180] sm:$0xff]  ;;  %v768_v41 = vld [vmem:[%s1373_s0 + $0x24] sm:$0xf0]  ;;  %v763_v43 = vor.u32 %v1014_v34, %v760_v35  ;;  %v767_v44 = vor.u32 %v1018_v37, %v766_v36  ;;  %v1067_v48 = vld [vmem:[%s1371_s1 + $0x170] sm:$0xff] }
  0x10   :  { %534 = vmatpush.bf16.msra.mxu2 %v1041_v14  ;;  %v771_v46 = vor.u32 %v1015_v40, %v768_v41  ;;  %v1058_v49 = vld [vmem:[%s1371_s1 + $0x128] sm:$0xff]  ;;  %v29_v51 = vld [vmem:[%s1373_s0 + $0x38] sm:$0xff]  ;;  %v30_v52 = vld [vmem:[%s1373_s0 + $0x40] sm:$0xff] }
  0x11   :  { %552 = vmatpush.bf16.msra.mxu3 %v1049_v15  ;;  %v1066_v50 = vld [vmem:[%s1371_s1 + $0x168] sm:$0xff]  ;;  %v1057_v53 = vld [vmem:[%s1371_s1 + $0x120] sm:$0xff]  ;;  %v161_v54 = vunpack.c.l.b16 %v29_v51  ;;  %v162_v55 = vunpack.c.h.b16 %v29_v51  ;;  %v163_v57 = vunpack.c.l.b16 %v30_v52  ;;  %v164_v58 = vunpack.c.h.b16 %v30_v52  ;;  %v1056_v59 = vld [vmem:[%s1371_s1 + $0x118] sm:$0xff] }
  0x12   :  { %499 = vmatpush.bf16.msra.mxu0 %v1024_v16  ;;  %v1065_v56 = vld [vmem:[%s1371_s1 + $0x160] sm:$0xff]  ;;  %v1064_v63 = vld [vmem:[%s1371_s1 + $0x158] sm:$0xff]  ;;  %v1055_v1 = vld [vmem:[%s1371_s1 + $0x110] sm:$0xff] }
  0x13   :  { %517 = vmatpush.bf16.msra.mxu1 %v1032_v17  ;;  %v175_v60 = vpack.c.b16 %v161_v54, %v161_v54  ;;  %v176_v61 = vpack.c.b16 %v162_v55, %v162_v55  ;;  %v177_v62 = vpack.c.b16 %v163_v57, %v163_v57  ;;  %v178_v0 = vpack.c.b16 %v164_v58, %v164_v58  ;;  %v1063_v2 = vld [vmem:[%s1371_s1 + $0x150] sm:$0xff]  ;;  %v1054_v3 = vld [vmem:[%s1371_s1 + $0x108] sm:$0xff]  ;;  %v1053_v5 = vld [vmem:[%s1371_s1 + $0x100] sm:$0xff] }
  0x14   :  { %535 = vmatpush.bf16.msra.mxu2 %v1040_v18  ;;  %v1062_v4 = vld [vmem:[%s1371_s1 + $0x148] sm:$0xff]  ;;  %v1061_v6 = vld [vmem:[%s1371_s1 + $0x140] sm:$0xff]  ;;  %v774_v7 = vld [vmem:[%s1373_s0 + $0x10] sm:$0xf] }
  0x15   :  { %553 = vmatpush.bf16.msra.mxu3 %v1048_v19  ;;  %v1019_v8 = vld [vmem:[%s1373_s0 + $0x28] sm:$0xf0]  ;;  %v1016_v9 = vld [vmem:[%s1373_s0 + $0x14] sm:$0xf]  ;;  %v776_v10 = vld [vmem:[%s1373_s0 + $0x2c] sm:$0xf0] }
  0x16   :  { %500 = vmatpush.bf16.msra.mxu0 %v1023_v20  ;;  %v782_v11 = vld [vmem:[%s1373_s0 + $0x18] sm:$0xf]  ;;  %v1020_v12 = vld [vmem:[%s1373_s0 + $0x30] sm:$0xf0]  ;;  %v775_v13 = vor.u32 %v1019_v8, %v774_v7  ;;  %v779_v14 = vor.u32 %v1016_v9, %v776_v10  ;;  %v31_v16 = vld [vmem:[%s1373_s0 + $0x48] sm:$0xff] }
  0x17   :  { %518 = vmatpush.bf16.msra.mxu1 %v1031_v21  ;;  %v783_v15 = vor.u32 %v1020_v12, %v782_v11  ;;  %v32_v17 = vld [vmem:[%s1373_s0 + $0x50] sm:$0xf]  ;;  %v165_v18 = vunpack.c.l.b16 %v31_v16  ;;  %v166_v19 = vunpack.c.h.b16 %v31_v16  ;;  %v1071_v36 = vld [vmem:[%s1375_s3 + $0x8] sm:$0xff]  ;;  %v1070_v41 = vld [vmem:[%s1375_s3] sm:$0xff] }
  0x18   :  { %536 = vmatpush.bf16.msra.mxu2 %v1039_v22  ;;  %v167_v20 = vunpack.c.l.b16 %v32_v17  ;;  %v1072_v35 = vld [vmem:[%s1375_s3 + $0x10] sm:$0xff] }
  0x19   :  { %554 = vmatpush.bf16.msra.mxu3 %v1047_v23  ;;  %v179_v21 = vpack.c.b16 %v165_v18, %v165_v18  ;;  %v180_v22 = vpack.c.b16 %v166_v19, %v166_v19 }
  0x1a   :  { %501 = vmatpush.bf16.msra.mxu0 %v1022_v24  ;;  %v181_v23 = vpack.c.b16 %v167_v20, %v167_v20  ;;  %v1077_v24 = vld [vmem:[%s1375_s3 + $0x38] sm:$0xff] }
  0x1b   :  { %519 = vmatpush.bf16.msra.mxu1 %v1030_v25  ;;  %v1076_v25 = vld [vmem:[%s1375_s3 + $0x30] sm:$0xff] }
  0x1c   :  { %537 = vmatpush.bf16.msra.mxu2 %v1038_v26  ;;  %v1075_v26 = vld [vmem:[%s1375_s3 + $0x28] sm:$0xff] }
  0x1d   :  { %555 = vmatpush.bf16.msra.mxu3 %v1046_v27 }
  0x1e   :  { %502 = vmatpush.bf16.msra.mxu0 %v1021_v28 }
  0x1f   :  { %520 = vmatpush.bf16.msra.mxu1 %v1029_v29  ;;  %v1074_v29 = vld [vmem:[%s1375_s3 + $0x20] sm:$0xff] }
  0x20   :  { %538 = vmatpush.bf16.msra.mxu2 %v1037_v30  ;;  %v1073_v30 = vld [vmem:[%s1375_s3 + $0x18] sm:$0xff] }
  0x21   :  { %556 = vmatpush.bf16.msra.mxu3 %v1045_v31  ;;  %503 = vmatmul.bf16.vlgmr.msra.gmra.mxu0 %v759_v42  ;;  %v1078_v42 = vld [vmem:[%s1372_s2] ss:$0 sm:$0xff] }
  0x22   :  { %567 = vmatpush.bf16.msrb.mxu0 %v1060_v39  ;;  %521 = vmatmul.bf16.vlgmr.msra.gmra.mxu1 %v763_v43 }
  0x23   :  { %539 = vmatmul.bf16.vlgmr.msra.gmra.mxu2 %v767_v44  ;;  %585 = vmatpush.bf16.msrb.mxu1 %v1068_v45 }
  0x24   :  { %610 = vmatpush.bf16.msrb.mxu2 %v1069_v38  ;;  %557 = vmatmul.bf16.vlgmr.msra.gmra.mxu3 %v771_v46 }
  0x25   :  { %694 = vmatpush.bf16.msrb.mxu3 %v1077_v24 }
  0x26   :  { %568 = vmatpush.bf16.msrb.mxu0 %v1059_v47 }
  0x27   :  { %586 = vmatpush.bf16.msrb.mxu1 %v1067_v48 }
  0x29   :  { %695 = vmatpush.bf16.msrb.mxu3 %v1076_v25 }
  0x2a   :  { %569 = vmatpush.bf16.msrb.mxu0 %v1058_v49 }
  0x2b   :  { %587 = vmatpush.bf16.msrb.mxu1 %v1066_v50 }
  0x2d   :  { %696 = vmatpush.bf16.msrb.mxu3 %v1075_v26 }
  0x2e   :  { %570 = vmatpush.bf16.msrb.mxu0 %v1057_v53 }
  0x2f   :  { %588 = vmatpush.bf16.msrb.mxu1 %v1065_v56 }
  0x31   :  { %508 = vmatmul.bf16.gmra.mxu0 %v175_v60  ;;  %697 = vmatpush.bf16.msrb.mxu3 %v1074_v29 }
  0x32   :  { %571 = vmatpush.bf16.msrb.mxu0 %v1056_v59  ;;  %526 = vmatmul.bf16.gmra.mxu1 %v176_v61 }
  0x33   :  { %544 = vmatmul.bf16.gmra.mxu2 %v177_v62  ;;  %589 = vmatpush.bf16.msrb.mxu1 %v1064_v63 }
  0x34   :  { %562 = vmatmul.bf16.gmra.mxu3 %v178_v0 }
  0x35   :  { %698 = vmatpush.bf16.msrb.mxu3 %v1073_v30 }
  0x36   :  { %572 = vmatpush.bf16.msrb.mxu0 %v1055_v1 }
  0x37   :  { %590 = vmatpush.bf16.msrb.mxu1 %v1063_v2 }
  0x39   :  { %699 = vmatpush.bf16.msrb.mxu3 %v1072_v35 }
  0x3a   :  { %573 = vmatpush.bf16.msrb.mxu0 %v1054_v3 }
  0x3b   :  { %591 = vmatpush.bf16.msrb.mxu1 %v1062_v4 }
  0x3d   :  { %700 = vmatpush.bf16.msrb.mxu3 %v1071_v36 }
  0x3e   :  { %574 = vmatpush.bf16.msrb.mxu0 %v1053_v5 }
  0x3f   :  { %592 = vmatpush.bf16.msrb.mxu1 %v1061_v6 }
  0x41   :  { %575 = vmatmul.bf16.vlgmr.msrb.gmra.mxu0 %v775_v13  ;;  %701 = vmatpush.bf16.msrb.mxu3 %v1070_v41 }
  0x42   :  { %593 = vmatmul.bf16.vlgmr.msrb.gmra.mxu1 %v779_v14 }
  0x43   :  { %980 = vmatmul.msk.bf16.vlgmr.msrb.gmra.mxu2 %vm488_vm0, %v783_v15 }
  0x51   :  { %580 = vmatmul.bf16.gmra.mxu0 %v179_v21 }
  0x52   :  { %598 = vmatmul.bf16.gmra.mxu1 %v180_v22 }
  0x53   :  { %981 = vmatmul.msk.bf16.gmra.mxu2 %vm488_vm0, %v181_v23  ;;  %v1079_v23 = vld [vmem:[%s1374_s4] ss:$0 sm:$0xff] }
  0x9e   :  { %v504_v27 = vpop.f32.mrf.mxu0 }
  0x9f   :  { %v522_v28 = vpop.f32.mrf.mxu1  ;;  %v505_v47 = vadd.f32 %v1078_v42, %v504_v27 }
  0xa1   :  { %v523_v48 = vadd.f32 %v522_v28, %v505_v47 }
  0xa6   :  { %v540_v31 = vpop.f32.mrf.mxu2  ;;  %v506_v32 = vpop.f32.mrf.mxu0 }
  0xa7   :  { %v524_v33 = vpop.f32.mrf.mxu1  ;;  %v558_v34 = vpop.f32.mrf.mxu3  ;;  %v507_v49 = vadd.f32 %v1078_v42, %v506_v32  ;;  %v541_v54 = vadd.f32 %v540_v31, %v523_v48 }
  0xa9   :  { %v525_v55 = vadd.f32 %v524_v33, %v507_v49  ;;  %v559_v57 = vadd.f32 %v558_v34, %v541_v54 }
  0xae   :  { %v542_v37 = vpop.f32.mrf.mxu2  ;;  %v509_v38 = vpop.f32.mrf.mxu0 }
  0xaf   :  { %v527_v39 = vpop.f32.mrf.mxu1  ;;  %v560_v40 = vpop.f32.mrf.mxu3  ;;  %v543_v56 = vadd.f32 %v542_v37, %v525_v55  ;;  %v510_v59 = vadd.f32 %v1078_v42, %v509_v38 }
  0xb1   :  { %v561_v60 = vadd.f32 %v560_v40, %v543_v56  ;;  %v528_v1 = vadd.f32 %v527_v39, %v510_v59 }
  0xb6   :  { %v545_v43 = vpop.f32.mrf.mxu2  ;;  %v511_v44 = vpop.f32.mrf.mxu0 }
  0xb7   :  { %v529_v45 = vpop.f32.mrf.mxu1  ;;  %v563_v46 = vpop.f32.mrf.mxu3  ;;  %v546_v6 = vadd.f32 %v545_v43, %v528_v1 }
  0xb9   :  { %v564_v12 = vadd.f32 %v563_v46, %v546_v6 }
  0xbe   :  { %v547_v50 = vpop.f32.mrf.mxu2  ;;  %v576_v51 = vpop.f32.mrf.mxu0 }
  0xbf   :  { %v594_v52 = vpop.f32.mrf.mxu1  ;;  %v565_v53 = vpop.f32.mrf.mxu3  ;;  %v577_v61 = vadd.f32 %v576_v51, %v559_v57 }
  0xc1   :  { %v595_v2 = vadd.f32 %v594_v52, %v577_v61 }
  0xc6   :  { %v612_v58 = vpop.f32.mrf.mxu2  ;;  %v578_v62 = vpop.f32.mrf.mxu0 }
  0xc7   :  { %v596_v63 = vpop.f32.mrf.mxu1  ;;  %v579_v0 = vadd.f32 %v578_v62, %v561_v60  ;;  %v613_v3 = vadd.f32 %v612_v58, %v595_v2 }
  0xc9   :  { %v597_v4 = vadd.f32 %v596_v63, %v579_v0  ;;  %v621_v10 = vmax.f32 %v613_v3, 0.0 }
  0xce   :  { %v614_v5 = vpop.f32.mrf.mxu2  ;;  %v581_v8 = vpop.f32.mrf.mxu0 }
  0xcf   :  { %v615_v7 = vadd.f32 %v614_v5, %v597_v4  ;;  %v599_v9 = vpop.f32.mrf.mxu1  ;;  %v582_v14 = vadd.f32 %v581_v8, %v564_v12 }
  0xd1   :  { %v622_v11 = vmax.f32 %v615_v7, 0.0  ;;  %v600_v18 = vadd.f32 %v599_v9, %v582_v14 }
  0xd3   :  { %v624_v13 = vpack.c.bf16 %v622_v11, %v621_v10 }
  0xd5   :  { %702 = vmatmul.bf16.vlgmr.msrb.gmra.mxu3 %v624_v13 }
  0xd6   :  { %v617_v15 = vpop.f32.mrf.mxu2  ;;  %v583_v16 = vpop.f32.mrf.mxu0 }
  0xd7   :  { %v601_v17 = vpop.f32.mrf.mxu1  ;;  %v618_v19 = vadd.f32 %v617_v15, %v600_v18 }
  0xd9   :  { %v623_v21 = vmax.f32 %v618_v19, 0.0 }
  0xdb   :  { %v625_v22 = vpack.c.bf16 %v623_v21, %v623_v21 }
  0xde   :  { %v619_v20 = vpop.f32.mrf.mxu2 }
  0xe5   :  { %707 = vmatmul.bf16.gmra.mxu3 %v625_v22 }
 0x158   :  { %v703_v24 = vpop.f32.mrf.mxu3 }
 0x159   :  { %v704_v25 = vadd.f32 %v1079_v23, %v703_v24 }
 0x15b   :  { %v713_v26 = vsel %vm712_vm1, %v704_v25, -inf }
 0x15c   :  { %714 = vmax.xlane.f32.xlu0 %v713_v26 }
 0x160   :  { %v705_v27 = vpop.f32.mrf.mxu3 }
 0x161   :  { %v706_v28 = vadd.f32 %v1079_v23, %v705_v27 }
 0x163   :  { %v716_v29 = vsel %vm712_vm1, %v706_v28, -inf }
 0x164   :  { %717 = vmax.xlane.f32.xlu0 %v716_v29 }
 0x168   :  { %v708_v30 = vpop.f32.mrf.mxu3 }
 0x169   :  { %v709_v31 = vadd.f32 %v1079_v23, %v708_v30 }
 0x16b   :  { %v719_v32 = vsel %vm712_vm1, %v709_v31, -inf }
 0x16c   :  { %720 = vmax.xlane.f32.xlu1 %v719_v32 }
 0x170   :  { %v710_v33 = vpop.f32.mrf.mxu3 }
 0x1cf   :  { %v715_v34 = vpop.xlane.xlu0 %714 }
 0x1d0   :  { %v722_v35 = vsub.f32 %v704_v25, %v715_v34 }
 0x1d2   :  { %v725_v36 = vmul.f32 1.442695, %v722_v35 }
 0x1d4   :  { %1080 = vpow2.f32 %v725_v36 }
 0x1d7   :  { %v718_v37 = vpop.xlane.xlu0 %717 }
 0x1d8   :  { %v723_v38 = vsub.f32 %v706_v28, %v718_v37 }
 0x1da   :  { %v1081_v39 = vpop.eup %1080  ;;  %v727_v40 = vmul.f32 1.442695, %v723_v38 }
 0x1db   :  { %v731_v41 = vsel %vm712_vm1, %v1081_v39, 0.0 }
 0x1dc   :  { %1082 = vpow2.f32 %v727_v40  ;;  %732 = vadd.xlane.f32.xlu1 %v731_v41 }
 0x1df   :  { %v721_v42 = vpop.xlane.xlu1 %720 }
 0x1e0   :  { %v724_v43 = vsub.f32 %v709_v31, %v721_v42 }
 0x1e2   :  { %v1083_v44 = vpop.eup %1082  ;;  %v729_v45 = vmul.f32 1.442695, %v724_v43 }
 0x1e3   :  { %v734_v46 = vsel %vm712_vm1, %v1083_v44, 0.0 }
 0x1e4   :  { %1084 = vpow2.f32 %v729_v45  ;;  %735 = vadd.xlane.f32.xlu2 %v734_v46 }
 0x1ea   :  { %v1085_v47 = vpop.eup %1084 }
 0x1eb   :  { %v737_v48 = vsel %vm712_vm1, %v1085_v47, 0.0 }
 0x1ec   :  { %738 = vadd.xlane.f32.xlu2 %v737_v48 }
 0x24f   :  { %v733_v49 = vpop.xlane.xlu1 %732 }
 0x250   :  { %1086 = vlog2.f32 %v733_v49 }
 0x256   :  { %v1087_v50 = vpop.eup %1086 }
 0x257   :  { %v741_v51 = vmul.f32 0.6931472, %v1087_v50  ;;  %v736_v52 = vpop.xlane.xlu2 %735 }
 0x258   :  { %1088 = vlog2.f32 %v736_v52 }
 0x259   :  { %v746_v53 = vsub.f32 %v722_v35, %v741_v51 }
 0x25b   :  { %749 = vst.msk [vmem:[%s1376_s5] sm:$0xff] %vm712_vm1, %v746_v53 }
 0x25e   :  { %v1089_v54 = vpop.eup %1088 }
 0x25f   :  { %v743_v55 = vmul.f32 0.6931472, %v1089_v54  ;;  %v739_v56 = vpop.xlane.xlu2 %738 }
 0x260   :  { %1090 = vlog2.f32 %v739_v56 }
 0x261   :  { %v747_v57 = vsub.f32 %v723_v38, %v743_v55 }
 0x263   :  { %750 = vst.msk [vmem:[%s1376_s5 + $0x8] sm:$0xff] %vm712_vm1, %v747_v57 }
 0x266   :  { %v1091_v58 = vpop.eup %1090 }
 0x267   :  { %v745_v59 = vmul.f32 0.6931472, %v1091_v58 }
 0x269   :  { %v748_v60 = vsub.f32 %v724_v43, %v745_v59 }
 0x26b   :  { %751 = vst.msk [vmem:[%s1376_s5 + $0x10] sm:$0xff] %vm712_vm1, %v748_v60 }

</bundles_post_ra>
